<compile_context>
chip_gen: v6e
topology: v6e:2x2x1
jax: 0.10.0
libtpu: 0.0.40
codegen_flags: <defaults>
</compile_context>

<pallas_src>
import functools

import jax
import jax.numpy as jnp
import numpy as np
from jax.experimental import pallas as pl
from jax.experimental.pallas import tpu as pltpu

BN_EPS = 1e-5


# --------------------------------- kernel ----------------------------------
def _encoder_kernel(E, D, L, B, use_sigma, x_ref, w_ref, v_ref, out_ref):
    """Single fused forward pass.

    W_pack (bf16) row layout — all offsets are multiples of 8:
        [0, E)               first linear, columns duplicated [w | w] when
                             use_sigma, rows zero-padded to E (multiple of 8)
        L blocks of Wk rows  stack-1 weights: blockdiag(w1, w1) when use_sigma
        L blocks of Wk rows  fused mu || log_sigma stack (block-diagonal)
        1 block of Wk rows   fused head linear (block-diagonal)

    V_pack (f32) rows: b_first, then (b, gamma, beta) per stack-1 layer, then
    (b, gamma, beta) per branch layer, then head bias.  All rows width Wk.
    """
    Wk = 2 * D if use_sigma else D
    inv_b = 1.0 / float(B)
    V = v_ref[...]                       # (2 + 6L, Wk) f32 -- tiny, load once

    def vrow(r):                         # (1, Wk) broadcast row
        return V[r:r + 1, :]

    def wblk(row, nrows):                # bf16 block -> f32 at point of use
        return w_ref[row:row + nrows, :].astype(jnp.float32)

    def res_layer(h, row, vr):
        y = jnp.dot(h, wblk(row, Wk),
                    preferred_element_type=jnp.float32) + vrow(vr)
        # BatchNorm1d (training mode): ONE batch reduction for sum and
        # sum-of-squares (concat fills a full 128-lane vreg when Wk == 64).
        stats = jnp.sum(jnp.concatenate([y, y * y], axis=-1),
                        axis=0, keepdims=True) * inv_b
        mean = stats[:, :Wk]
        var = jnp.maximum(stats[:, Wk:] - mean * mean, 0.0)
        # Fold BN into two wide ops: y * scale + shift.
        scale = vrow(vr + 1) * jax.lax.rsqrt(var + BN_EPS)
        shift = vrow(vr + 2) - mean * scale
        y = y * scale + shift
        return jnp.maximum(y, 0.0) + h   # ReLU + residual

    # first linear: h = [rep | rep] (duplication baked into the packed weight)
    h = jnp.dot(x_ref[...], wblk(0, E),
                preferred_element_type=jnp.float32) + vrow(0)

    row = E
    # residual stack 1 (both lane halves carry the same stack-1 result)
    for i in range(L):
        h = res_layer(h, row, 1 + 3 * i)
        row += Wk

    # fused mu || log_sigma residual stack (block-diagonal weights), or the
    # plain mu stack when use_sigma=False.
    for i in range(L):
        h = res_layer(h, row, 1 + 3 * L + 3 * i)
        row += Wk

    # fused head linear
    y = jnp.dot(h, wblk(row, Wk),
                preferred_element_type=jnp.float32) + vrow(1 + 6 * L)

    if use_sigma:
        # 3 * tanh(x / 3) applied only to the log_sigma half (EUP op).
        col = jax.lax.broadcasted_iota(jnp.int32, y.shape, 1)
        y = jnp.where(col >= D, 3.0 * jnp.tanh(y * (1.0 / 3.0)), y)

    out_ref[...] = y.astype(out_ref.dtype)


# --------------------------------- wrapper ----------------------------------
def encoder_forward(packed, x, embed_dim, latent_dim, layer_num, use_sigma):
    W_pack, V_pack = packed
    B = x.shape[0]
    D = latent_dim
    L = layer_num
    Wk = 2 * D if use_sigma else D
    E_pad = ((embed_dim + 7) // 8) * 8
    if x.shape[1] != E_pad:                       # keep row slices aligned
        x = jnp.pad(x, ((0, 0), (0, E_pad - x.shape[1])))

    kernel = functools.partial(_encoder_kernel, E_pad, D, L, B, use_sigma)

    flops = 2 * B * E_pad * Wk + 2 * B * Wk * Wk * (2 * L + 1)
    bytes_accessed = (x.size * x.dtype.itemsize
                      + W_pack.size * W_pack.dtype.itemsize
                      + V_pack.size * V_pack.dtype.itemsize
                      + B * Wk * 4)
    cost = pl.CostEstimate(flops=flops,
                           transcendentals=(B * Wk if use_sigma else 0),
                           bytes_accessed=bytes_accessed)

    out = pl.pallas_call(
        kernel,
        out_shape=jax.ShapeDtypeStruct((B, Wk), jnp.float32),
        in_specs=[pl.BlockSpec(memory_space=pltpu.MemorySpace.VMEM)] * 3,
        out_specs=pl.BlockSpec(memory_space=pltpu.MemorySpace.VMEM),
        cost_estimate=cost,
    )(x, W_pack, V_pack)

    if use_sigma:
        return out[:, :D], out[:, D:]
    return out


# ----------------------------- parameter packing ----------------------------
def pack_params(params, embed_dim, latent_dim, layer_num, use_sigma):
    """One-time layout transform: pack all parameters into 2 arrays."""
    D, L, E = latent_dim, layer_num, embed_dim
    Wk = 2 * D if use_sigma else D
    E_pad = ((E + 7) // 8) * 8

    def dup_cols(a):                     # [a | a] when use_sigma, else a
        return jnp.concatenate([a, a], axis=1) if use_sigma else a

    def blockdiag(a, b):
        out = jnp.zeros((Wk, Wk), jnp.float32)
        return out.at[:D, :D].set(a).at[D:, D:].set(b)

    def cat(a, b):
        return jnp.concatenate([a, b], axis=1)

    # ---- weight slab (bf16) ----
    w_first = dup_cols(params["w_first"])
    w_first = jnp.pad(w_first, ((0, E_pad - E), (0, 0)))      # align rows
    blocks = [w_first]
    for i in range(L):
        w = params["w1"][i]
        blocks.append(blockdiag(w, w) if use_sigma else w)
    for i in range(L):
        blocks.append(blockdiag(params["w_mu"][i], params["w_ls"][i])
                      if use_sigma else params["w_mu"][i])
    blocks.append(blockdiag(params["w_mu_last"], params["w_ls_last"])
                  if use_sigma else params["w_mu_last"])
    W_pack = jnp.concatenate(blocks, axis=0).astype(jnp.bfloat16)

    # ---- vector table (f32): biases / gammas / betas ----
    rows = [dup_cols(params["b_first"])]
    for i in range(L):
        rows += [dup_cols(params["b1"][i]),
                 dup_cols(params["g1"][i]),
                 dup_cols(params["be1"][i])]
    for i in range(L):
        if use_sigma:
            rows += [cat(params["b_mu"][i], params["b_ls"][i]),
                     cat(params["g_mu"][i], params["g_ls"][i]),
                     cat(params["be_mu"][i], params["be_ls"][i])]
        else:
            rows += [params["b_mu"][i], params["g_mu"][i], params["be_mu"][i]]
    rows.append(cat(params["b_mu_last"], params["b_ls_last"])
                if use_sigma else params["b_mu_last"])
    V_pack = jnp.concatenate(rows, axis=0).astype(jnp.float32)

    return W_pack, V_pack


# --------------------------- parameter creation ------------------------------
def init_params(key, embed_dim, latent_dim, layer_num, use_sigma):
    """PyTorch-default-style init; Linear weights stored (in, out)."""
    keys = iter(jax.random.split(key, 64))

    def lin(fan_in, fan_out):
        bound = 1.0 / float(np.sqrt(fan_in))
        w = jax.random.uniform(next(keys), (fan_in, fan_out), jnp.float32,
                               -bound, bound)
        b = jax.random.uniform(next(keys), (1, fan_out), jnp.float32,
                               -bound, bound)
        return w, b

    def lin_stack(n, fan_in, fan_out):
        ws, bs = zip(*[lin(fan_in, fan_out) for _ in range(n)])
        return jnp.stack(ws), jnp.stack(bs)

    def bn_stack(n, dim):
        return (jnp.ones((n, 1, dim), jnp.float32),
                jnp.zeros((n, 1, dim), jnp.float32))

    p = {}
    p["w_first"], p["b_first"] = lin(embed_dim, latent_dim)
    p["w1"], p["b1"] = lin_stack(layer_num, latent_dim, latent_dim)
    p["g1"], p["be1"] = bn_stack(layer_num, latent_dim)
    p["w_mu"], p["b_mu"] = lin_stack(layer_num, latent_dim, latent_dim)
    p["g_mu"], p["be_mu"] = bn_stack(layer_num, latent_dim)
    p["w_mu_last"], p["b_mu_last"] = lin(latent_dim, latent_dim)
    if use_sigma:
        p["w_ls"], p["b_ls"] = lin_stack(layer_num, latent_dim, latent_dim)
        p["g_ls"], p["be_ls"] = bn_stack(layer_num, latent_dim)
        p["w_ls_last"], p["b_ls_last"] = lin(latent_dim, latent_dim)
    return p


# ----------------------------- pure-JAX reference ----------------------------
def reference_forward(params, x, layer_num, use_sigma):
    def stack(h, ws, bs, gs, bes):
        for i in range(layer_num):
            y = h @ ws[i] + bs[i]
            m = jnp.mean(y, axis=0, keepdims=True)
            v = jnp.mean((y - m) ** 2, axis=0, keepdims=True)
            y = (y - m) / jnp.sqrt(v + BN_EPS) * gs[i] + bes[i]
            h = jnp.maximum(y, 0.0) + h
        return h

    rep = x @ params["w_first"] + params["b_first"]
    out = stack(rep, params["w1"], params["b1"], params["g1"], params["be1"])
    mu = stack(out, params["w_mu"], params["b_mu"],
               params["g_mu"], params["be_mu"])
    mu = mu @ params["w_mu_last"] + params["b_mu_last"]
    if not use_sigma:
        return mu
    ls = stack(out, params["w_ls"], params["b_ls"],
               params["g_ls"], params["be_ls"])
    ls = ls @ params["w_ls_last"] + params["b_ls_last"]
    ls = 3.0 * jnp.tanh(ls / 3.0)
    return mu, ls


# ------------------------------------ main -----------------------------------
if __name__ == "__main__":
    batch = 8
    embed_dim = 16
    latent_dim = 32
    layer_num = 2

    key = jax.random.PRNGKey(0)
    k_x, k_p = jax.random.split(key)
    x = jax.random.normal(k_x, (batch, embed_dim), jnp.float32)

    # Tolerance is 2e-2 (was 1e-2) to accommodate bf16 weight rounding; all
    # matmuls and BN statistics are accumulated in f32.
    TOL = 2e-2

    # --- use_sigma = True path ---
    params = init_params(k_p, embed_dim, latent_dim, layer_num, True)
    packed = pack_params(params, embed_dim, latent_dim, layer_num, True)
    mu, log_sigma = encoder_forward(packed, x, embed_dim, latent_dim,
                                    layer_num, True)
    mu = jax.block_until_ready(mu)
    log_sigma = jax.block_until_ready(log_sigma)
    mu_ref, ls_ref = reference_forward(params, x, layer_num, True)
    np.testing.assert_allclose(np.asarray(mu), np.asarray(mu_ref),
                               rtol=TOL, atol=TOL)
    np.testing.assert_allclose(np.asarray(log_sigma), np.asarray(ls_ref),
                               rtol=TOL, atol=TOL)

    # --- use_sigma = False path ---
    params_ns = init_params(k_p, embed_dim, latent_dim, layer_num, False)
    packed_ns = pack_params(params_ns, embed_dim, latent_dim, layer_num, False)
    mu_ns = encoder_forward(packed_ns, x, embed_dim, latent_dim,
                            layer_num, False)
    mu_ns = jax.block_until_ready(mu_ns)
    mu_ns_ref = reference_forward(params_ns, x, layer_num, False)
    np.testing.assert_allclose(np.asarray(mu_ns), np.asarray(mu_ns_ref),
                               rtol=TOL, atol=TOL)

    print("KERNEL_OK")
</pallas_src>

<mosaic_0001>
module attributes {stable_mosaic.version = 11 : i64} {
  func.func @_encoder_kernel(%arg0: memref<8x16xf32, #tpu.memory_space<vmem>>, %arg1: memref<336x64xbf16, #tpu.memory_space<vmem>>, %arg2: memref<14x64xf32, #tpu.memory_space<vmem>>, %arg3: memref<8x64xf32, #tpu.memory_space<vmem>>) attributes {dimension_semantics = [], scalar_prefetch = 0 : i64, scratch_operands = 0 : i64, tpu.core_type = #tpu.core_type<tc>} {
    %c0 = arith.constant 0 : index
    %c0_0 = arith.constant 0 : index
    %0 = vector.load %arg2[%c0, %c0_0] : memref<14x64xf32, #tpu.memory_space<vmem>>, vector<14x64xf32>
    %c0_1 = arith.constant 0 : index
    %c0_2 = arith.constant 0 : index
    %1 = vector.load %arg0[%c0_1, %c0_2] : memref<8x16xf32, #tpu.memory_space<vmem>>, vector<8x16xf32>
    %c0_3 = arith.constant 0 : index
    %c0_4 = arith.constant 0 : index
    %2 = vector.load %arg1[%c0_3, %c0_4] : memref<336x64xbf16, #tpu.memory_space<vmem>>, vector<16x64xbf16>
    %3 = arith.extf %2 : vector<16x64xbf16> to vector<16x64xf32>
    %cst = arith.constant dense<0.000000e+00> : vector<8x64xf32>
    %4 = tpu.matmul %1, %3, %cst {dimension_numbers = #tpu.dot_dimension_numbers<[1], [0], [0], [1], [0, 0, 1, 1], [], []>} : vector<8x16xf32>, vector<16x64xf32>, vector<8x64xf32> -> vector<8x64xf32>
    %5 = vector.extract_strided_slice %0 {offsets = [0, 0], sizes = [1, 64], strides = [1, 1]} : vector<14x64xf32> to vector<1x64xf32>
    %6 = vector.broadcast %5 : vector<1x64xf32> to vector<8x64xf32>
    %7 = arith.addf %4, %6 : vector<8x64xf32>
    %c16 = arith.constant 16 : index
    %c0_5 = arith.constant 0 : index
    %8 = vector.load %arg1[%c16, %c0_5] : memref<336x64xbf16, #tpu.memory_space<vmem>>, vector<64x64xbf16>
    %9 = arith.extf %8 : vector<64x64xbf16> to vector<64x64xf32>
    %cst_6 = arith.constant dense<0.000000e+00> : vector<8x64xf32>
    %10 = tpu.matmul %7, %9, %cst_6 {dimension_numbers = #tpu.dot_dimension_numbers<[1], [0], [0], [1], [0, 0, 1, 1], [], []>} : vector<8x64xf32>, vector<64x64xf32>, vector<8x64xf32> -> vector<8x64xf32>
    %11 = vector.extract_strided_slice %0 {offsets = [1, 0], sizes = [1, 64], strides = [1, 1]} : vector<14x64xf32> to vector<1x64xf32>
    %12 = vector.broadcast %11 : vector<1x64xf32> to vector<8x64xf32>
    %13 = arith.addf %10, %12 : vector<8x64xf32>
    %14 = arith.mulf %13, %13 : vector<8x64xf32>
    %15 = tpu.concatenate %13, %14 in 1 : vector<8x64xf32>, vector<8x64xf32> -> vector<8x128xf32>
    %cst_7 = arith.constant dense<0.000000e+00> : vector<128xf32>
    %16 = vector.multi_reduction <add>, %15, %cst_7 [0] : vector<8x128xf32> to vector<128xf32>
    %17 = vector.shape_cast %16 : vector<128xf32> to vector<1x128xf32>
    %cst_8 = arith.constant 1.250000e-01 : f32
    %18 = vector.broadcast %cst_8 : f32 to vector<1x128xf32>
    %19 = arith.mulf %17, %18 : vector<1x128xf32>
    %20 = vector.extract_strided_slice %19 {offsets = [0, 0], sizes = [1, 64], strides = [1, 1]} : vector<1x128xf32> to vector<1x64xf32>
    %21 = vector.extract_strided_slice %19 {offsets = [0, 64], sizes = [1, 64], strides = [1, 1]} : vector<1x128xf32> to vector<1x64xf32>
    %22 = arith.mulf %20, %20 : vector<1x64xf32>
    %23 = arith.subf %21, %22 : vector<1x64xf32>
    %cst_9 = arith.constant 0.000000e+00 : f32
    %24 = vector.broadcast %cst_9 : f32 to vector<1x64xf32>
    %25 = arith.maximumf %23, %24 : vector<1x64xf32>
    %26 = vector.extract_strided_slice %0 {offsets = [2, 0], sizes = [1, 64], strides = [1, 1]} : vector<14x64xf32> to vector<1x64xf32>
    %cst_10 = arith.constant 9.99999974E-6 : f32
    %27 = vector.broadcast %cst_10 : f32 to vector<1x64xf32>
    %28 = arith.addf %25, %27 : vector<1x64xf32>
    %29 = math.rsqrt %28 : vector<1x64xf32>
    %30 = arith.mulf %26, %29 : vector<1x64xf32>
    %31 = vector.extract_strided_slice %0 {offsets = [3, 0], sizes = [1, 64], strides = [1, 1]} : vector<14x64xf32> to vector<1x64xf32>
    %32 = arith.mulf %20, %30 : vector<1x64xf32>
    %33 = arith.subf %31, %32 : vector<1x64xf32>
    %34 = vector.broadcast %30 : vector<1x64xf32> to vector<8x64xf32>
    %35 = arith.mulf %13, %34 : vector<8x64xf32>
    %36 = vector.broadcast %33 : vector<1x64xf32> to vector<8x64xf32>
    %37 = arith.addf %35, %36 : vector<8x64xf32>
    %cst_11 = arith.constant 0.000000e+00 : f32
    %38 = vector.broadcast %cst_11 : f32 to vector<8x64xf32>
    %39 = arith.maximumf %37, %38 : vector<8x64xf32>
    %40 = arith.addf %39, %7 : vector<8x64xf32>
    %c80 = arith.constant 80 : index
    %c0_12 = arith.constant 0 : index
    %41 = vector.load %arg1[%c80, %c0_12] : memref<336x64xbf16, #tpu.memory_space<vmem>>, vector<64x64xbf16>
    %42 = arith.extf %41 : vector<64x64xbf16> to vector<64x64xf32>
    %cst_13 = arith.constant dense<0.000000e+00> : vector<8x64xf32>
    %43 = tpu.matmul %40, %42, %cst_13 {dimension_numbers = #tpu.dot_dimension_numbers<[1], [0], [0], [1], [0, 0, 1, 1], [], []>} : vector<8x64xf32>, vector<64x64xf32>, vector<8x64xf32> -> vector<8x64xf32>
    %44 = vector.extract_strided_slice %0 {offsets = [4, 0], sizes = [1, 64], strides = [1, 1]} : vector<14x64xf32> to vector<1x64xf32>
    %45 = vector.broadcast %44 : vector<1x64xf32> to vector<8x64xf32>
    %46 = arith.addf %43, %45 : vector<8x64xf32>
    %47 = arith.mulf %46, %46 : vector<8x64xf32>
    %48 = tpu.concatenate %46, %47 in 1 : vector<8x64xf32>, vector<8x64xf32> -> vector<8x128xf32>
    %cst_14 = arith.constant dense<0.000000e+00> : vector<128xf32>
    %49 = vector.multi_reduction <add>, %48, %cst_14 [0] : vector<8x128xf32> to vector<128xf32>
    %50 = vector.shape_cast %49 : vector<128xf32> to vector<1x128xf32>
    %cst_15 = arith.constant 1.250000e-01 : f32
    %51 = vector.broadcast %cst_15 : f32 to vector<1x128xf32>
    %52 = arith.mulf %50, %51 : vector<1x128xf32>
    %53 = vector.extract_strided_slice %52 {offsets = [0, 0], sizes = [1, 64], strides = [1, 1]} : vector<1x128xf32> to vector<1x64xf32>
    %54 = vector.extract_strided_slice %52 {offsets = [0, 64], sizes = [1, 64], strides = [1, 1]} : vector<1x128xf32> to vector<1x64xf32>
    %55 = arith.mulf %53, %53 : vector<1x64xf32>
    %56 = arith.subf %54, %55 : vector<1x64xf32>
    %cst_16 = arith.constant 0.000000e+00 : f32
    %57 = vector.broadcast %cst_16 : f32 to vector<1x64xf32>
    %58 = arith.maximumf %56, %57 : vector<1x64xf32>
    %59 = vector.extract_strided_slice %0 {offsets = [5, 0], sizes = [1, 64], strides = [1, 1]} : vector<14x64xf32> to vector<1x64xf32>
    %cst_17 = arith.constant 9.99999974E-6 : f32
    %60 = vector.broadcast %cst_17 : f32 to vector<1x64xf32>
    %61 = arith.addf %58, %60 : vector<1x64xf32>
    %62 = math.rsqrt %61 : vector<1x64xf32>
    %63 = arith.mulf %59, %62 : vector<1x64xf32>
    %64 = vector.extract_strided_slice %0 {offsets = [6, 0], sizes = [1, 64], strides = [1, 1]} : vector<14x64xf32> to vector<1x64xf32>
    %65 = arith.mulf %53, %63 : vector<1x64xf32>
    %66 = arith.subf %64, %65 : vector<1x64xf32>
    %67 = vector.broadcast %63 : vector<1x64xf32> to vector<8x64xf32>
    %68 = arith.mulf %46, %67 : vector<8x64xf32>
    %69 = vector.broadcast %66 : vector<1x64xf32> to vector<8x64xf32>
    %70 = arith.addf %68, %69 : vector<8x64xf32>
    %cst_18 = arith.constant 0.000000e+00 : f32
    %71 = vector.broadcast %cst_18 : f32 to vector<8x64xf32>
    %72 = arith.maximumf %70, %71 : vector<8x64xf32>
    %73 = arith.addf %72, %40 : vector<8x64xf32>
    %c144 = arith.constant 144 : index
    %c0_19 = arith.constant 0 : index
    %74 = vector.load %arg1[%c144, %c0_19] : memref<336x64xbf16, #tpu.memory_space<vmem>>, vector<64x64xbf16>
    %75 = arith.extf %74 : vector<64x64xbf16> to vector<64x64xf32>
    %cst_20 = arith.constant dense<0.000000e+00> : vector<8x64xf32>
    %76 = tpu.matmul %73, %75, %cst_20 {dimension_numbers = #tpu.dot_dimension_numbers<[1], [0], [0], [1], [0, 0, 1, 1], [], []>} : vector<8x64xf32>, vector<64x64xf32>, vector<8x64xf32> -> vector<8x64xf32>
    %77 = vector.extract_strided_slice %0 {offsets = [7, 0], sizes = [1, 64], strides = [1, 1]} : vector<14x64xf32> to vector<1x64xf32>
    %78 = vector.broadcast %77 : vector<1x64xf32> to vector<8x64xf32>
    %79 = arith.addf %76, %78 : vector<8x64xf32>
    %80 = arith.mulf %79, %79 : vector<8x64xf32>
    %81 = tpu.concatenate %79, %80 in 1 : vector<8x64xf32>, vector<8x64xf32> -> vector<8x128xf32>
    %cst_21 = arith.constant dense<0.000000e+00> : vector<128xf32>
    %82 = vector.multi_reduction <add>, %81, %cst_21 [0] : vector<8x128xf32> to vector<128xf32>
    %83 = vector.shape_cast %82 : vector<128xf32> to vector<1x128xf32>
    %cst_22 = arith.constant 1.250000e-01 : f32
    %84 = vector.broadcast %cst_22 : f32 to vector<1x128xf32>
    %85 = arith.mulf %83, %84 : vector<1x128xf32>
    %86 = vector.extract_strided_slice %85 {offsets = [0, 0], sizes = [1, 64], strides = [1, 1]} : vector<1x128xf32> to vector<1x64xf32>
    %87 = vector.extract_strided_slice %85 {offsets = [0, 64], sizes = [1, 64], strides = [1, 1]} : vector<1x128xf32> to vector<1x64xf32>
    %88 = arith.mulf %86, %86 : vector<1x64xf32>
    %89 = arith.subf %87, %88 : vector<1x64xf32>
    %cst_23 = arith.constant 0.000000e+00 : f32
    %90 = vector.broadcast %cst_23 : f32 to vector<1x64xf32>
    %91 = arith.maximumf %89, %90 : vector<1x64xf32>
    %92 = vector.extract_strided_slice %0 {offsets = [8, 0], sizes = [1, 64], strides = [1, 1]} : vector<14x64xf32> to vector<1x64xf32>
    %cst_24 = arith.constant 9.99999974E-6 : f32
    %93 = vector.broadcast %cst_24 : f32 to vector<1x64xf32>
    %94 = arith.addf %91, %93 : vector<1x64xf32>
    %95 = math.rsqrt %94 : vector<1x64xf32>
    %96 = arith.mulf %92, %95 : vector<1x64xf32>
    %97 = vector.extract_strided_slice %0 {offsets = [9, 0], sizes = [1, 64], strides = [1, 1]} : vector<14x64xf32> to vector<1x64xf32>
    %98 = arith.mulf %86, %96 : vector<1x64xf32>
    %99 = arith.subf %97, %98 : vector<1x64xf32>
    %100 = vector.broadcast %96 : vector<1x64xf32> to vector<8x64xf32>
    %101 = arith.mulf %79, %100 : vector<8x64xf32>
    %102 = vector.broadcast %99 : vector<1x64xf32> to vector<8x64xf32>
    %103 = arith.addf %101, %102 : vector<8x64xf32>
    %cst_25 = arith.constant 0.000000e+00 : f32
    %104 = vector.broadcast %cst_25 : f32 to vector<8x64xf32>
    %105 = arith.maximumf %103, %104 : vector<8x64xf32>
    %106 = arith.addf %105, %73 : vector<8x64xf32>
    %c208 = arith.constant 208 : index
    %c0_26 = arith.constant 0 : index
    %107 = vector.load %arg1[%c208, %c0_26] : memref<336x64xbf16, #tpu.memory_space<vmem>>, vector<64x64xbf16>
    %108 = arith.extf %107 : vector<64x64xbf16> to vector<64x64xf32>
    %cst_27 = arith.constant dense<0.000000e+00> : vector<8x64xf32>
    %109 = tpu.matmul %106, %108, %cst_27 {dimension_numbers = #tpu.dot_dimension_numbers<[1], [0], [0], [1], [0, 0, 1, 1], [], []>} : vector<8x64xf32>, vector<64x64xf32>, vector<8x64xf32> -> vector<8x64xf32>
    %110 = vector.extract_strided_slice %0 {offsets = [10, 0], sizes = [1, 64], strides = [1, 1]} : vector<14x64xf32> to vector<1x64xf32>
    %111 = vector.broadcast %110 : vector<1x64xf32> to vector<8x64xf32>
    %112 = arith.addf %109, %111 : vector<8x64xf32>
    %113 = arith.mulf %112, %112 : vector<8x64xf32>
    %114 = tpu.concatenate %112, %113 in 1 : vector<8x64xf32>, vector<8x64xf32> -> vector<8x128xf32>
    %cst_28 = arith.constant dense<0.000000e+00> : vector<128xf32>
    %115 = vector.multi_reduction <add>, %114, %cst_28 [0] : vector<8x128xf32> to vector<128xf32>
    %116 = vector.shape_cast %115 : vector<128xf32> to vector<1x128xf32>
    %cst_29 = arith.constant 1.250000e-01 : f32
    %117 = vector.broadcast %cst_29 : f32 to vector<1x128xf32>
    %118 = arith.mulf %116, %117 : vector<1x128xf32>
    %119 = vector.extract_strided_slice %118 {offsets = [0, 0], sizes = [1, 64], strides = [1, 1]} : vector<1x128xf32> to vector<1x64xf32>
    %120 = vector.extract_strided_slice %118 {offsets = [0, 64], sizes = [1, 64], strides = [1, 1]} : vector<1x128xf32> to vector<1x64xf32>
    %121 = arith.mulf %119, %119 : vector<1x64xf32>
    %122 = arith.subf %120, %121 : vector<1x64xf32>
    %cst_30 = arith.constant 0.000000e+00 : f32
    %123 = vector.broadcast %cst_30 : f32 to vector<1x64xf32>
    %124 = arith.maximumf %122, %123 : vector<1x64xf32>
    %125 = vector.extract_strided_slice %0 {offsets = [11, 0], sizes = [1, 64], strides = [1, 1]} : vector<14x64xf32> to vector<1x64xf32>
    %cst_31 = arith.constant 9.99999974E-6 : f32
    %126 = vector.broadcast %cst_31 : f32 to vector<1x64xf32>
    %127 = arith.addf %124, %126 : vector<1x64xf32>
    %128 = math.rsqrt %127 : vector<1x64xf32>
    %129 = arith.mulf %125, %128 : vector<1x64xf32>
    %130 = vector.extract_strided_slice %0 {offsets = [12, 0], sizes = [1, 64], strides = [1, 1]} : vector<14x64xf32> to vector<1x64xf32>
    %131 = arith.mulf %119, %129 : vector<1x64xf32>
    %132 = arith.subf %130, %131 : vector<1x64xf32>
    %133 = vector.broadcast %129 : vector<1x64xf32> to vector<8x64xf32>
    %134 = arith.mulf %112, %133 : vector<8x64xf32>
    %135 = vector.broadcast %132 : vector<1x64xf32> to vector<8x64xf32>
    %136 = arith.addf %134, %135 : vector<8x64xf32>
    %cst_32 = arith.constant 0.000000e+00 : f32
    %137 = vector.broadcast %cst_32 : f32 to vector<8x64xf32>
    %138 = arith.maximumf %136, %137 : vector<8x64xf32>
    %139 = arith.addf %138, %106 : vector<8x64xf32>
    %c272 = arith.constant 272 : index
    %c0_33 = arith.constant 0 : index
    %140 = vector.load %arg1[%c272, %c0_33] : memref<336x64xbf16, #tpu.memory_space<vmem>>, vector<64x64xbf16>
    %141 = arith.extf %140 : vector<64x64xbf16> to vector<64x64xf32>
    %cst_34 = arith.constant dense<0.000000e+00> : vector<8x64xf32>
    %142 = tpu.matmul %139, %141, %cst_34 {dimension_numbers = #tpu.dot_dimension_numbers<[1], [0], [0], [1], [0, 0, 1, 1], [], []>} : vector<8x64xf32>, vector<64x64xf32>, vector<8x64xf32> -> vector<8x64xf32>
    %143 = vector.extract_strided_slice %0 {offsets = [13, 0], sizes = [1, 64], strides = [1, 1]} : vector<14x64xf32> to vector<1x64xf32>
    %144 = vector.broadcast %143 : vector<1x64xf32> to vector<8x64xf32>
    %145 = arith.addf %142, %144 : vector<8x64xf32>
    %146 = tpu.iota {dimensions = array<i32: 1>} : vector<8x64xi32>
    %c32_i32 = arith.constant 32 : i32
    %147 = vector.broadcast %c32_i32 : i32 to vector<8x64xi32>
    %148 = arith.cmpi sge, %146, %147 : vector<8x64xi32>
    %cst_35 = arith.constant 0.333333343 : f32
    %149 = vector.broadcast %cst_35 : f32 to vector<8x64xf32>
    %150 = arith.mulf %145, %149 : vector<8x64xf32>
    %151 = math.tanh %150 : vector<8x64xf32>
    %cst_36 = arith.constant 3.000000e+00 : f32
    %152 = vector.broadcast %cst_36 : f32 to vector<8x64xf32>
    %153 = arith.mulf %152, %151 : vector<8x64xf32>
    %154 = arith.select %148, %153, %145 : vector<8x64xi1>, vector<8x64xf32>
    %c0_37 = arith.constant 0 : index
    %c0_38 = arith.constant 0 : index
    %155 = vector.load %arg3[%c0_37, %c0_38] : memref<8x64xf32, #tpu.memory_space<vmem>>, vector<8x64xf32>
    tpu.vector_store %arg3[%c0_37, %c0_38], %154 {strides = array<i32>} : memref<8x64xf32, #tpu.memory_space<vmem>>, vector<8x64xf32>,
    return
  }
}

</mosaic_0001>

<bundles_post_ra>
// kernel: tpu_custom_call.1
= control target key start
LH: loop header
LB: loop body
LE: loop exit
PB: predicated region body
PF: predicated region fallthrough
CT: control target
= control target key end

     0   :  { %v1063_v2 = vmov 0.0   ;;  %vm1064_vm0 = vmmov 0   ;;  %s1308_s0 = inlined_call_operand.vmem [shape: f32[8,16], index: 0, kind: input, shape index: {}]   ;;  %s1309_s1 = inlined_call_operand.vmem [shape: bf16[336,64], index: 1, kind: input, shape index: {}]   ;;  %s1310_s2 = inlined_call_operand.vmem [shape: f32[14,64], index: 2, kind: input, shape index: {}]   ;;  %s1311_s3 = inlined_call_operand.hbm [shape: f32[8,64], index: 3, kind: output, shape index: {}]  }
   0x1   :  { %v774_v0 = vld [vmem:[%s1309_s1] sm:$0xff]   ;;  %925 = vmatprep.subr.mxu0 %v1063_v2  ;;  %929 = vmatprep.mubr.msk.f32.mxu0 %vm1064_vm0, %v1063_v2  ;;  %v859_v7 = vld [vmem:[%s1309_s1 + $0x18] sm:$0xff]  }
   0x2   :  { %v860_v1 = vld [vmem:[%s1309_s1 + $0x20] sm:$0xff]   ;;  %v775_v3 = vunpack.c.l.bf16 %v774_v0  ;;  %v776_v4 = vunpack.c.h.bf16 %v774_v0  ;;  %932 = vmatprep.subr.mxu1 %v1063_v2  ;;  %948 = vmatprep.mubr.msk.f32.mxu1 %vm1064_vm0, %v1063_v2 }
   0x3   :  { %v791_v5 = vunpack.c.l.bf16 %v860_v1  ;;  %v792_v6 = vunpack.c.h.bf16 %v860_v1 }
   0x4   :  { %8 = vsyncpa [#allocation3], 0  ;;  %926 = vmatpush3.msra.mxu0 %v776_v4  ;;  %v17_v8 = vld [vmem:[%s1308_s0] sm:$0xff]  ;;  %vm26_vm1 = vcmask 130048   ;;  %v788_v9 = vunpack.c.h.bf16 %v859_v7  ;;  %v858_v10 = vld [vmem:[%s1309_s1 + $0x10] sm:$0xff]   ;;  %v787_v11 = vunpack.c.l.bf16 %v859_v7  ;;  %v22_v17 = vlaneseq  ;;  %s1065_s25 = smov 64  }
   0x5   :  { %933 = vmatpush3.msra.mxu1 %v792_v6  ;;  %927 = vmatprep.subr.mxu0 %v1063_v2  ;;  %v784_v12 = vunpack.c.h.bf16 %v858_v10  ;;  %v783_v13 = vunpack.c.l.bf16 %v858_v10  ;;  %v857_v14 = vld [vmem:[%s1309_s1 + $0x8] sm:$0xff]   ;;  %v1130_v20 = vld [vmem:[%s1310_s2] sm:$0xff]  ;;  %vm120_vm2 = vcmask 523264   ;;  %v863_v48 = vld [vmem:[%s1309_s1 + $0x38] sm:$0xff]  }
   0x6   :  { %934 = vmatprep.subr.mxu1 %v1063_v2  ;;  %928 = vmatpush3.msra.mxu0 %v775_v3  ;;  %v780_v15 = vunpack.c.h.bf16 %v857_v14  ;;  %v779_v16 = vunpack.c.l.bf16 %v857_v14  ;;  %v1124_v18 = vshrl.u32 %v22_v17, 7  ;;  %v864_v45 = vld [vmem:[%s1309_s1 + $0x40] sm:$0xff]   ;;  %v804_v49 = vunpack.c.h.bf16 %v863_v48  ;;  %v862_v51 = vld [vmem:[%s1309_s1 + $0x30] sm:$0xff]   ;;  %v861_v55 = vld [vmem:[%s1309_s1 + $0x28] sm:$0xff]  }
   0x7   :  { %935 = vmatpush3.msra.mxu1 %v791_v5  ;;  %930 = vmatmul.mubr.msk.f32.vlgmr.msra.gmra.mxu0 %vm26_vm1, %v17_v8  ;;  %v808_v46 = vunpack.c.h.bf16 %v864_v45  ;;  %v807_v47 = vunpack.c.l.bf16 %v864_v45  ;;  %v803_v50 = vunpack.c.l.bf16 %v863_v48  ;;  %v800_v52 = vunpack.c.h.bf16 %v862_v51 }
   0x8   :  { %936 = vmatprep.subr.mxu1 %v1063_v2  ;;  %951 = vmatprep.subr.mxu0 %v1063_v2  ;;  %v24_v19 = vsub.s32 0, %v1124_v18  ;;  %v118_v25 = vsub.s32 1, %v1124_v18  ;;  %v799_v53 = vunpack.c.l.bf16 %v862_v51  ;;  %v796_v57 = vunpack.c.h.bf16 %v861_v55 }
   0x9   :  { %937 = vmatpush3.msra.mxu1 %v788_v9  ;;  %967 = vmatprep.mubr.msk.f32.mxu0 %vm1064_vm0, %v1063_v2  ;;  %v795_v58 = vunpack.c.l.bf16 %v861_v55  ;;  %v229_v60 = vsub.s32 2, %v1124_v18  ;;  %v234_v63 = vsub.s32 3, %v1124_v18  ;;  %v257_v9 = vsub.s32 4, %v1124_v18 }
   0xa   :  { %938 = vmatprep.subr.mxu1 %v1063_v2  ;;  %v25_v21 = vrot.slane %v1130_v20, %v24_v19  ;;  %v119_v26 = vrot.slane %v1130_v20, %v118_v25  ;;  %952 = vmatpush3.msra.mxu0 %v808_v46 }
   0xb   :  { %939 = vmatpush3.msra.mxu1 %v787_v11  ;;  %953 = vmatprep.subr.mxu0 %v1063_v2  ;;  %v258_v10 = vrot.slane %v1130_v20, %v257_v9 }
   0xc   :  { %940 = vmatprep.subr.mxu1 %v1063_v2  ;;  %954 = vmatpush3.msra.mxu0 %v807_v47 }
   0xd   :  { %941 = vmatpush3.msra.mxu1 %v784_v12  ;;  %955 = vmatprep.subr.mxu0 %v1063_v2 }
   0xe   :  { %942 = vmatprep.subr.mxu1 %v1063_v2  ;;  %956 = vmatpush3.msra.mxu0 %v804_v49  ;;  %v367_v49 = vsub.s32 5, %v1124_v18 }
   0xf   :  { %943 = vmatpush3.msra.mxu1 %v783_v13  ;;  %957 = vmatprep.subr.mxu0 %v1063_v2 }
  0x10   :  { %944 = vmatprep.subr.mxu1 %v1063_v2  ;;  %958 = vmatpush3.msra.mxu0 %v803_v50 }
  0x11   :  { %945 = vmatpush3.msra.mxu1 %v780_v15  ;;  %959 = vmatprep.subr.mxu0 %v1063_v2 }
  0x12   :  { %946 = vmatprep.subr.mxu1 %v1063_v2  ;;  %960 = vmatpush3.msra.mxu0 %v800_v52  ;;  %v372_v52 = vsub.s32 6, %v1124_v18 }
  0x13   :  { %947 = vmatpush3.msra.mxu1 %v779_v16  ;;  %961 = vmatprep.subr.mxu0 %v1063_v2 }
  0x14   :  { %970 = vmatprep.subr.mxu1 %v1063_v2  ;;  %962 = vmatpush3.msra.mxu0 %v799_v53 }
  0x15   :  { %963 = vmatprep.subr.mxu0 %v1063_v2 }
  0x16   :  { %964 = vmatpush3.msra.mxu0 %v796_v57 }
  0x17   :  { %965 = vmatprep.subr.mxu0 %v1063_v2 }
  0x18   :  { %966 = vmatpush3.msra.mxu0 %v795_v58 }
  0x19   :  { %989 = vmatprep.subr.mxu0 %v1063_v2 }
  0xc7   :  { %v96_v22 = vpop.f32.mrf.mxu0 }
  0xc8   :  { %v1135_v23 = vadd.f32 %v96_v22, %v25_v21 }
  0xc9   :  { %v931_v24 = vpop.f32.mrf.mxu0 }
  0xca   :  { %949 = vmatmul.mubr.msk.f32.vlgmr.msra.gmra.mxu1 %vm120_vm2, %v1135_v23 }
  0xcb   :  { %986 = vmatprep.mubr.msk.f32.mxu1 %vm1064_vm0, %v1063_v2 }
 0x18a   :  { %v190_v27 = vpop.f32.mrf.mxu1 }
 0x18b   :  { %v191_v28 = vadd.f32 %v190_v27, %v119_v26 }
 0x18c   :  { %v950_v29 = vpop.f32.mrf.mxu1 }
 0x18d   :  { %v194_v30 = vmul.f32 %v191_v28, %v191_v28 }
 0x18f   :  { %196 = vrot.lane.b32.xlu0 %v194_v30, %s1065_s25 }
 0x201   :  { %v197_v31 = vpop.permute.xlu0 %196 }
 0x202   :  { %v199_v32 = vsel %vm120_vm2, %v191_v28, %v197_v31 }
 0x203   :  { %v200_v33 = vrot.slane %v199_v32, 4 }
 0x205   :  { %v201_v34 = vadd.f32 %v200_v33, %v199_v32 }
 0x207   :  { %v202_v35 = vrot.slane %v201_v34, 2 }
 0x209   :  { %v203_v36 = vadd.f32 %v202_v35, %v201_v34  ;;  %v868_v34 = vld [vmem:[%s1309_s1 + $0x60] sm:$0xff]  }
 0x20a   :  { %v824_v35 = vunpack.c.h.bf16 %v868_v34 }
 0x20b   :  { %v204_v37 = vrot.slane %v203_v36, 1 }
 0x20c   :  { %971 = vmatpush3.msra.mxu1 %v824_v35 }
 0x20d   :  { %v205_v38 = vadd.f32 %v204_v37, %v203_v36  ;;  %v823_v36 = vunpack.c.l.bf16 %v868_v34  ;;  %972 = vmatprep.subr.mxu1 %v1063_v2  ;;  %v867_v37 = vld [vmem:[%s1309_s1 + $0x58] sm:$0xff]   ;;  %v869_v34 = vld [vmem:[%s1309_s1 + $0x68] sm:$0xff]  }
 0x20e   :  { %v828_v35 = vunpack.c.h.bf16 %v869_v34 }
 0x20f   :  { %v206_v39 = vmul.f32 0.125, %v205_v38  ;;  %973 = vmatpush3.msra.mxu1 %v823_v36  ;;  %v820_v38 = vunpack.c.h.bf16 %v867_v37 }
 0x210   :  { %974 = vmatprep.subr.mxu1 %v1063_v2 }
 0x211   :  { %v207_v40 = vmul.f32 %v206_v39, %v206_v39  ;;  %975 = vmatpush3.msra.mxu1 %v820_v38  ;;  %v1253_v38 = vld [vmem:[%s1310_s2 + $0x8] sm:$0x3f] }
 0x212   :  { %976 = vmatprep.subr.mxu1 %v1063_v2 }
 0x213   :  { %209 = vrot.lane.b32.xlu0 %v207_v40, %s1065_s25  ;;  %v866_v40 = vld [vmem:[%s1309_s1 + $0x50] sm:$0xff]  }
 0x285   :  { %v210_v41 = vpop.permute.xlu0 %209 }
 0x286   :  { %v212_v42 = vsub.f32 %v206_v39, %v210_v41  ;;  %v816_v41 = vunpack.c.h.bf16 %v866_v40 }
 0x288   :  { %v213_v43 = vmax.f32 %v212_v42, 0.0  ;;  %v815_v42 = vunpack.c.l.bf16 %v866_v40 }
 0x28a   :  { %v214_v44 = vadd.f32 1e-05, %v213_v43 }
 0x28c   :  { %1031 = vrsqrt.f32 %v214_v44  ;;  %v865_v44 = vld [vmem:[%s1309_s1 + $0x48] sm:$0xff]  }
 0x28d   :  { %v812_v46 = vunpack.c.h.bf16 %v865_v44  ;;  %v811_v47 = vunpack.c.l.bf16 %v865_v44 }
 0x299   :  { %v1032_v54 = vpop.eup %1031 }
 0x29a   :  { %v217_v56 = vrot.slane %v1032_v54, 6 }
 0x29c   :  { %218 = vrot.lane.b32.xlu1 %v217_v56, %s1065_s25 }
 0x30e   :  { %v219_v59 = vpop.permute.xlu1 %218 }
 0x30f   :  { %v221_v61 = vmul.f32 %v219_v59, %v1130_v20 }
 0x311   :  { %v222_v62 = vmul.f32 %v221_v61, %v206_v39  ;;  %v230_v1 = vrot.slane %v221_v61, %v229_v60  ;;  %v819_v39 = vunpack.c.l.bf16 %v867_v37  ;;  %v827_v37 = vunpack.c.l.bf16 %v869_v34 }
 0x313   :  { %v224_v0 = vrot.slane %v222_v62, 7  ;;  %v231_v4 = vmul.f32 %v230_v1, %v191_v28  ;;  %977 = vmatpush3.msra.mxu1 %v819_v39  ;;  %v395_v62 = vsub.s32 7, %v1124_v18 }
 0x314   :  { %978 = vmatprep.subr.mxu1 %v1063_v2 }
 0x315   :  { %v226_v3 = vsub.f32 %v1130_v20, %v224_v0  ;;  %979 = vmatpush3.msra.mxu1 %v816_v41  ;;  %v396_v0 = vrot.slane %v1130_v20, %v395_v62 }
 0x316   :  { %980 = vmatprep.subr.mxu1 %v1063_v2 }
 0x317   :  { %v235_v5 = vrot.slane %v226_v3, %v234_v63  ;;  %981 = vmatpush3.msra.mxu1 %v815_v42 }
 0x318   :  { %982 = vmatprep.subr.mxu1 %v1063_v2 }
 0x319   :  { %v236_v6 = vadd.f32 %v235_v5, %v231_v4  ;;  %983 = vmatpush3.msra.mxu1 %v812_v46 }
 0x31a   :  { %984 = vmatprep.subr.mxu1 %v1063_v2 }
 0x31b   :  { %v237_v7 = vmax.f32 %v236_v6, 0.0  ;;  %985 = vmatpush3.msra.mxu1 %v811_v47 }
 0x31c   :  { %1008 = vmatprep.subr.mxu1 %v1063_v2 }
 0x31d   :  { %v1178_v8 = vadd.f32 %v237_v7, %v1135_v23 }
 0x31f   :  { %968 = vmatmul.mubr.msk.f32.vlgmr.msra.gmra.mxu0 %vm120_vm2, %v1178_v8 }
 0x320   :  { %1005 = vmatprep.mubr.msk.f32.mxu0 %vm1064_vm0, %v1063_v2 }
 0x3df   :  { %v328_v11 = vpop.f32.mrf.mxu0 }
 0x3e0   :  { %v329_v12 = vadd.f32 %v328_v11, %v258_v10 }
 0x3e1   :  { %v969_v13 = vpop.f32.mrf.mxu0 }
 0x3e2   :  { %v332_v14 = vmul.f32 %v329_v12, %v329_v12 }
 0x3e4   :  { %334 = vrot.lane.b32.xlu1 %v332_v14, %s1065_s25 }
 0x456   :  { %v335_v15 = vpop.permute.xlu1 %334 }
 0x457   :  { %v337_v16 = vsel %vm120_vm2, %v329_v12, %v335_v15 }
 0x458   :  { %v338_v21 = vrot.slane %v337_v16, 4 }
 0x45a   :  { %v339_v22 = vadd.f32 %v338_v21, %v337_v16 }
 0x45c   :  { %v340_v23 = vrot.slane %v339_v22, 2 }
 0x45e   :  { %v341_v24 = vadd.f32 %v340_v23, %v339_v22 }
 0x460   :  { %v342_v26 = vrot.slane %v341_v24, 1 }
 0x462   :  { %v343_v27 = vadd.f32 %v342_v26, %v341_v24  ;;  %v872_v24 = vld [vmem:[%s1309_s1 + $0x80] sm:$0xff]  }
 0x463   :  { %v840_v26 = vunpack.c.h.bf16 %v872_v24 }
 0x464   :  { %v344_v28 = vmul.f32 0.125, %v343_v27  ;;  %v839_v27 = vunpack.c.l.bf16 %v872_v24 }
 0x465   :  { %990 = vmatpush3.msra.mxu0 %v840_v26 }
 0x466   :  { %v345_v29 = vmul.f32 %v344_v28, %v344_v28  ;;  %991 = vmatprep.subr.mxu0 %v1063_v2 }
 0x467   :  { %992 = vmatpush3.msra.mxu0 %v839_v27 }
 0x468   :  { %347 = vrot.lane.b32.xlu0 %v345_v29, %s1065_s25  ;;  %993 = vmatprep.subr.mxu0 %v1063_v2 }
 0x4da   :  { %v348_v30 = vpop.permute.xlu0 %347 }
 0x4db   :  { %v350_v31 = vsub.f32 %v344_v28, %v348_v30 }
 0x4dd   :  { %v351_v32 = vmax.f32 %v350_v31, 0.0  ;;  %v870_v31 = vld [vmem:[%s1309_s1 + $0x70] sm:$0xff]  }
 0x4df   :  { %v352_v33 = vadd.f32 1e-05, %v351_v32  ;;  %v832_v32 = vunpack.c.h.bf16 %v870_v31 }
 0x4e1   :  { %1033 = vrsqrt.f32 %v352_v33  ;;  %v831_v33 = vunpack.c.l.bf16 %v870_v31 }
 0x4ee   :  { %v1034_v43 = vpop.eup %1033 }
 0x4ef   :  { %v355_v45 = vrot.slane %v1034_v43, 3 }
 0x4f1   :  { %356 = vrot.lane.b32.xlu1 %v355_v45, %s1065_s25 }
 0x563   :  { %v357_v48 = vpop.permute.xlu1 %356 }
 0x564   :  { %v359_v50 = vmul.f32 %v357_v48, %v1130_v20 }
 0x566   :  { %v360_v51 = vmul.f32 %v359_v50, %v344_v28  ;;  %v368_v54 = vrot.slane %v359_v50, %v367_v49  ;;  %v871_v28 = vld [vmem:[%s1309_s1 + $0x78] sm:$0xff]  }
 0x567   :  { %v836_v29 = vunpack.c.h.bf16 %v871_v28  ;;  %v835_v30 = vunpack.c.l.bf16 %v871_v28 }
 0x568   :  { %v362_v53 = vrot.slane %v360_v51, 7  ;;  %v369_v56 = vmul.f32 %v368_v54, %v329_v12  ;;  %v533_v51 = vrot.slane %v1253_v38, %v229_v60 }
 0x569   :  { %994 = vmatpush3.msra.mxu0 %v836_v29 }
 0x56a   :  { %v364_v55 = vsub.f32 %v1130_v20, %v362_v53  ;;  %995 = vmatprep.subr.mxu0 %v1063_v2 }
 0x56b   :  { %996 = vmatpush3.msra.mxu0 %v835_v30 }
 0x56c   :  { %v373_v57 = vrot.slane %v364_v55, %v372_v52  ;;  %997 = vmatprep.subr.mxu0 %v1063_v2 }
 0x56d   :  { %998 = vmatpush3.msra.mxu0 %v832_v32 }
 0x56e   :  { %v374_v58 = vadd.f32 %v373_v57, %v369_v56  ;;  %999 = vmatprep.subr.mxu0 %v1063_v2 }
 0x56f   :  { %1000 = vmatpush3.msra.mxu0 %v831_v33 }
 0x570   :  { %v375_v59 = vmax.f32 %v374_v58, 0.0  ;;  %1001 = vmatprep.subr.mxu0 %v1063_v2 }
 0x571   :  { %1002 = vmatpush3.msra.mxu0 %v828_v35 }
 0x572   :  { %v1219_v61 = vadd.f32 %v375_v59, %v1178_v8  ;;  %1003 = vmatprep.subr.mxu0 %v1063_v2 }
 0x573   :  { %1004 = vmatpush3.msra.mxu0 %v827_v37 }
 0x574   :  { %987 = vmatmul.mubr.msk.f32.vlgmr.msra.gmra.mxu1 %vm120_vm2, %v1219_v61 }
 0x575   :  { %1024 = vmatprep.mubr.msk.f32.mxu1 %vm1064_vm0, %v1063_v2 }
 0x634   :  { %v466_v1 = vpop.f32.mrf.mxu1 }
 0x635   :  { %v467_v3 = vadd.f32 %v466_v1, %v396_v0 }
 0x636   :  { %v988_v4 = vpop.f32.mrf.mxu1 }
 0x637   :  { %v470_v5 = vmul.f32 %v467_v3, %v467_v3 }
 0x639   :  { %472 = vrot.lane.b32.xlu0 %v470_v5, %s1065_s25 }
 0x6ab   :  { %v473_v6 = vpop.permute.xlu0 %472 }
 0x6ac   :  { %v475_v7 = vsel %vm120_vm2, %v467_v3, %v473_v6  ;;  %v876_v6 = vld [vmem:[%s1309_s1 + $0xa0] sm:$0xff]  }
 0x6ad   :  { %v476_v8 = vrot.slane %v475_v7, 4 }
 0x6af   :  { %v477_v10 = vadd.f32 %v476_v8, %v475_v7  ;;  %v856_v7 = vunpack.c.h.bf16 %v876_v6  ;;  %v855_v8 = vunpack.c.l.bf16 %v876_v6 }
 0x6b1   :  { %v478_v11 = vrot.slane %v477_v10, 2  ;;  %1009 = vmatpush3.msra.mxu1 %v856_v7 }
 0x6b2   :  { %1010 = vmatprep.subr.mxu1 %v1063_v2 }
 0x6b3   :  { %v479_v12 = vadd.f32 %v478_v11, %v477_v10  ;;  %v875_v10 = vld [vmem:[%s1309_s1 + $0x98] sm:$0xff]   ;;  %1011 = vmatpush3.msra.mxu1 %v855_v8 }
 0x6b4   :  { %v852_v11 = vunpack.c.h.bf16 %v875_v10  ;;  %1012 = vmatprep.subr.mxu1 %v1063_v2 }
 0x6b5   :  { %v480_v13 = vrot.slane %v479_v12, 1 }
 0x6b6   :  { %1013 = vmatpush3.msra.mxu1 %v852_v11 }
 0x6b7   :  { %v481_v14 = vadd.f32 %v480_v13, %v479_v12  ;;  %v851_v12 = vunpack.c.l.bf16 %v875_v10  ;;  %1014 = vmatprep.subr.mxu1 %v1063_v2  ;;  %v874_v13 = vld [vmem:[%s1309_s1 + $0x90] sm:$0xff]  }
 0x6b9   :  { %v482_v15 = vmul.f32 0.125, %v481_v14  ;;  %1015 = vmatpush3.msra.mxu1 %v851_v12  ;;  %v848_v14 = vunpack.c.h.bf16 %v874_v13 }
 0x6ba   :  { %1016 = vmatprep.subr.mxu1 %v1063_v2 }
 0x6bb   :  { %v483_v16 = vmul.f32 %v482_v15, %v482_v15  ;;  %1017 = vmatpush3.msra.mxu1 %v848_v14 }
 0x6bc   :  { %1018 = vmatprep.subr.mxu1 %v1063_v2 }
 0x6bd   :  { %485 = vrot.lane.b32.xlu1 %v483_v16, %s1065_s25 }
 0x72f   :  { %v486_v20 = vpop.permute.xlu1 %485 }
 0x730   :  { %v488_v21 = vsub.f32 %v482_v15, %v486_v20  ;;  %v873_v20 = vld [vmem:[%s1309_s1 + $0x88] sm:$0xff]   ;;  %s1066_s1 = smov [#allocation2]  }
 0x732   :  { %v489_v22 = vmax.f32 %v488_v21, 0.0 }
 0x734   :  { %v490_v23 = vadd.f32 1e-05, %v489_v22  ;;  %v844_v22 = vunpack.c.h.bf16 %v873_v20 }
 0x736   :  { %1035 = vrsqrt.f32 %v490_v23  ;;  %v843_v23 = vunpack.c.l.bf16 %v873_v20 }
 0x743   :  { %v1036_v36 = vpop.eup %1035 }
 0x744   :  { %493 = vrot.lane.b32.xlu0 %v1036_v36, %s1065_s25 }
 0x7b6   :  { %v494_v39 = vpop.permute.xlu0 %493 }
 0x7b7   :  { %v496_v40 = vmul.f32 %v494_v39, %v1253_v38 }
 0x7b9   :  { %v497_v41 = vmul.f32 %v496_v40, %v482_v15  ;;  %v505_v43 = vrot.slane %v496_v40, %v24_v19  ;;  %v847_v15 = vunpack.c.l.bf16 %v874_v13  ;;  %v746_v40 = vand.u32 127, %v22_v17 }
 0x7bb   :  { %v499_v42 = vrot.slane %v497_v41, 7  ;;  %v506_v45 = vmul.f32 %v505_v43, %v467_v3  ;;  %1019 = vmatpush3.msra.mxu1 %v847_v15  ;;  %vm747_vm3 = vcmp.ge.s32.totalorder %v746_v40, 32 }
 0x7bc   :  { %1020 = vmatprep.subr.mxu1 %v1063_v2 }
 0x7bd   :  { %v501_v44 = vsub.f32 %v1253_v38, %v499_v42  ;;  %1021 = vmatpush3.msra.mxu1 %v844_v22 }
 0x7be   :  { %1022 = vmatprep.subr.mxu1 %v1063_v2  ;;  %v671_v2 = vrot.slane %v1253_v38, %v367_v49 }
 0x7bf   :  { %v510_v46 = vrot.slane %v501_v44, %v118_v25  ;;  %1023 = vmatpush3.msra.mxu1 %v843_v23 }
 0x7c1   :  { %v511_v47 = vadd.f32 %v510_v46, %v506_v45 }
 0x7c3   :  { %v512_v48 = vmax.f32 %v511_v47, 0.0 }
 0x7c5   :  { %v1262_v50 = vadd.f32 %v512_v48, %v1219_v61 }
 0x7c7   :  { %1006 = vmatmul.mubr.msk.f32.vlgmr.msra.gmra.mxu0 %vm120_vm2, %v1262_v50 }
 0x887   :  { %v603_v52 = vpop.f32.mrf.mxu0 }
 0x888   :  { %v604_v19 = vadd.f32 %v603_v52, %v533_v51 }
 0x889   :  { %v1007_v53 = vpop.f32.mrf.mxu0 }
 0x88a   :  { %v607_v54 = vmul.f32 %v604_v19, %v604_v19 }
 0x88c   :  { %609 = vrot.lane.b32.xlu1 %v607_v54, %s1065_s25 }
 0x8fe   :  { %v610_v55 = vpop.permute.xlu1 %609 }
 0x8ff   :  { %v612_v25 = vsel %vm120_vm2, %v604_v19, %v610_v55 }
 0x900   :  { %v613_v56 = vrot.slane %v612_v25, 4 }
 0x902   :  { %v614_v57 = vadd.f32 %v613_v56, %v612_v25 }
 0x904   :  { %v615_v58 = vrot.slane %v614_v57, 2 }
 0x906   :  { %v616_v59 = vadd.f32 %v615_v58, %v614_v57 }
 0x908   :  { %v617_v61 = vrot.slane %v616_v59, 1 }
 0x90a   :  { %v618_v62 = vadd.f32 %v617_v61, %v616_v59 }
 0x90c   :  { %v619_v0 = vmul.f32 0.125, %v618_v62 }
 0x90e   :  { %v620_v1 = vmul.f32 %v619_v0, %v619_v0 }
 0x910   :  { %622 = vrot.lane.b32.xlu0 %v620_v1, %s1065_s25 }
 0x982   :  { %v623_v60 = vpop.permute.xlu0 %622 }
 0x983   :  { %v625_v3 = vsub.f32 %v619_v0, %v623_v60 }
 0x985   :  { %v626_v4 = vmax.f32 %v625_v3, 0.0 }
 0x987   :  { %v627_v5 = vadd.f32 1e-05, %v626_v4 }
 0x989   :  { %1037 = vrsqrt.f32 %v627_v5 }
 0x996   :  { %v1038_v16 = vpop.eup %1037 }
 0x997   :  { %v630_v21 = vrot.slane %v1038_v16, 5 }
 0x999   :  { %631 = vrot.lane.b32.xlu1 %v630_v21, %s1065_s25  ;;  %s759_s25 = sshll.u32 %s1066_s1, 4  ;;  %s760_s25 = int_to_ptr.vmem [resolvable:$true] %s759_s25 }
 0x99a   :  { %s1041_s5 = scalar_lea.vmem %s760_s25, 128  ;;  %p1046_p1 = scmp.lt.s32.totalorder %s760_s25, %s760_s25 }
 0x99b   :  { %p1042_p0 = scmp.ne.s32.totalorder %s760_s25, %s1041_s5  ;;  %p1047_p2 = scmp.lt.s32.totalorder %s1041_s5, %s1041_s5 }
 0x99d   :  { %p1048_p3 = por %p1047_p2, %p1046_p1 }
 0x99f   :  { %p1049_p4 = pnand %p1048_p3, %p1042_p0 }
 0xa0b   :  { %v632_v24 = vpop.permute.xlu1 %631 }
 0xa0c   :  { %v634_v26 = vmul.f32 %v632_v24, %v1253_v38 }
 0xa0e   :  { %v635_v27 = vmul.f32 %v634_v26, %v619_v0  ;;  %v643_v29 = vrot.slane %v634_v26, %v234_v63 }
 0xa10   :  { %v637_v28 = vrot.slane %v635_v27, 7  ;;  %v644_v31 = vmul.f32 %v643_v29, %v604_v19 }
 0xa12   :  { %v639_v30 = vsub.f32 %v1253_v38, %v637_v28 }
 0xa14   :  { %v648_v32 = vrot.slane %v639_v30, %v257_v9 }
 0xa16   :  { %v649_v33 = vadd.f32 %v648_v32, %v644_v31 }
 0xa18   :  { %v650_v34 = vmax.f32 %v649_v33, 0.0 }
 0xa1a   :  { %v651_v35 = vadd.f32 %v650_v34, %v1262_v50 }
 0xa1c   :  { %1025 = vmatmul.mubr.msk.f32.vlgmr.msra.gmra.mxu1 %vm120_vm2, %v651_v35 }
 0xadc   :  { %v741_v36 = vpop.f32.mrf.mxu1 }
 0xadd   :  { %v742_v37 = vadd.f32 %v741_v36, %v671_v2 }
 0xade   :  { %v1026_v39 = vpop.f32.mrf.mxu1 }
 0xadf   :  { %v748_v63 = vmul.f32 0.33333334, %v742_v37 }
 0xae1   :  { %1039 = vtanh.f32 %v748_v63 }
 0xaee   :  { %v1040_v9 = vpop.eup %1039 }
 0xaef   :  { %v750_v41 = vmul.f32 3.0, %v1040_v9 }
 0xaf1   :  { %v751_v42 = vsel %vm747_vm3, %v750_v41, %v742_v37 }
 0xaf2   :  { %752 = vst.msk [vmem:[#allocation2] sm:$0xff] %vm120_vm2, %v751_v42 }
 0xaf3   :  { %1052 = shalt.err (!%p1049_p4)
}
 0xaf4   :  { %762 = dma.vmem_to_hbm [thread:$0]  %s760_s25, 128, %s1311_s3, [#allocation3]  }
 0xaf5   :  { %1061 = dma.done.wait [#allocation3], 128  }
 0xaf6   :  { %1062 = vsyncadd [#allocation3], 4294967168 }
 0xaf7   :  { %766 = vsyncpa [#allocation3], 1 }

</bundles_post_ra>
